<compile_context>
chip_gen: v5e
topology: v5e:2x2
jax: 0.10.0
libtpu: 0.0.40
codegen_flags: <defaults>
</compile_context>

<pallas_src>
import functools

import jax
import jax.numpy as jnp
from jax.experimental import pallas as pl
from jax.experimental.pallas import tpu as pltpu

_LANES = 128
_SUBLANES = 8
_MAX_BLOCK_ROWS = 4096  # 4096 x 128 f32 = 2 MiB per input block


def _fold_to_tile(val):
    """(block_rows, 128) -> (8, 128) partial sums.

    The reshape keeps every (8, 128) f32 vreg-tile intact (no relayout); the
    reduction over the leading, untiled axis lowers to plain vreg adds (VALU),
    so the hot loop never touches the XLU.
    """
    return jnp.sum(val.reshape(-1, _SUBLANES, _LANES), axis=0)


# ----------------------------------------------------------------------------
# Kernels (hot path: elementwise VPU/EUP work + deferred cross-lane reduction)
# ----------------------------------------------------------------------------
def _iou_sums_kernel(logits_ref, targets_ref, out_ref, inter_acc, total_acc):
    """Accumulates [sum(sigmoid(l)*t), sum(sigmoid(l)+t)] into SMEM out_ref (2,)."""
    @pl.when(pl.program_id(0) == 0)
    def _init():
        inter_acc[...] = jnp.zeros_like(inter_acc)
        total_acc[...] = jnp.zeros_like(total_acc)

    p = jax.nn.sigmoid(logits_ref[...].astype(jnp.float32))
    t = targets_ref[...].astype(jnp.float32)
    inter_acc[...] += _fold_to_tile(p * t)
    total_acc[...] += _fold_to_tile(p + t)

    @pl.when(pl.program_id(0) == pl.num_programs(0) - 1)
    def _finalize():
        out_ref[0] = jnp.sum(inter_acc[...])
        out_ref[1] = jnp.sum(total_acc[...])


def _sq_diff_sum_kernel(a_ref, b_ref, out_ref, acc):
    """Accumulates sum((a - b)^2) into SMEM out_ref (1,). Zero-padded tails add 0."""
    @pl.when(pl.program_id(0) == 0)
    def _init():
        acc[...] = jnp.zeros_like(acc)

    d = a_ref[...].astype(jnp.float32) - b_ref[...].astype(jnp.float32)
    acc[...] += _fold_to_tile(d * d)

    @pl.when(pl.program_id(0) == pl.num_programs(0) - 1)
    def _finalize():
        out_ref[0] = jnp.sum(acc[...])


def _weighted_sq_sum_kernel(w_ref, d_ref, out_ref, acc):
    """Accumulates sum(w * d^2) into SMEM out_ref (1,). Zero-padded tails add 0."""
    @pl.when(pl.program_id(0) == 0)
    def _init():
        acc[...] = jnp.zeros_like(acc)

    w = w_ref[...].astype(jnp.float32)
    d = d_ref[...].astype(jnp.float32)
    acc[...] += _fold_to_tile(w * d * d)

    @pl.when(pl.program_id(0) == pl.num_programs(0) - 1)
    def _finalize():
        out_ref[0] = jnp.sum(acc[...])


# ----------------------------------------------------------------------------
# Glue: flatten arbitrary-shaped tensors into (rows, 128) tiles (tail pad only)
# ----------------------------------------------------------------------------
def _choose_block_rows(n):
    rows = -(-n // _LANES)
    rows8 = -(-rows // _SUBLANES) * _SUBLANES
    return min(_MAX_BLOCK_ROWS, rows8)


def _flatten_tiles(a, block_rows):
    """Flatten (row-major, same as torch's layout-agnostic reductions), zero
    tail-pad to a multiple of block_rows*128, reshape to (rows, 128)."""
    if not jnp.issubdtype(a.dtype, jnp.floating):
        a = a.astype(jnp.float32)
    flat = a.reshape(-1)
    n = flat.shape[0]
    block_elems = block_rows * _LANES
    pad = (-n) % block_elems
    if pad:
        flat = jnp.pad(flat, (0, pad))
    return flat.reshape((n + pad) // _LANES, _LANES), n, pad


def _reduce_call(kernel, arrays, out_len, block_rows, num_acc):
    rows_p = arrays[0].shape[0]
    grid = (rows_p // block_rows,)
    tile_spec = pl.BlockSpec((block_rows, _LANES), lambda i: (i, 0))
    return pl.pallas_call(
        kernel,
        out_shape=jax.ShapeDtypeStruct((out_len,), jnp.float32),
        grid_spec=pltpu.PrefetchScalarGridSpec(
            num_scalar_prefetch=0,
            grid=grid,
            in_specs=[tile_spec] * len(arrays),
            out_specs=pl.BlockSpec(memory_space=pltpu.SMEM),
            scratch_shapes=[pltpu.VMEM((_SUBLANES, _LANES), jnp.float32)] * num_acc,
        ),
        compiler_params=pltpu.CompilerParams(
            dimension_semantics=("arbitrary",)),  # reduction axis -> accumulator
    )(*arrays)


# ----------------------------------------------------------------------------
# ReconIoULoss forward
# ----------------------------------------------------------------------------
@functools.partial(jax.jit,
                   static_argnames=("alpha", "use_sparsity_loss", "smooth"))
def recon_iou_loss(recon, x, mask, y, vector=None, density=None,
                   alpha=1.0, use_sparsity_loss=False, smooth=1e-4):
    # ---- IoULoss(mask, y) ----
    br_m = _choose_block_rows(mask.size)
    m_tiles, _, pad_m = _flatten_tiles(mask, br_m)
    y_tiles, _, _ = _flatten_tiles(y, br_m)
    sums = _reduce_call(_iou_sums_kernel, [m_tiles, y_tiles], 2, br_m, 2)
    intersection = sums[0]
    # padded logits are 0 -> sigmoid = 0.5; padded targets are 0 -> each pad
    # element adds exactly 0.5 to `total` and nothing to `intersection`.
    total = sums[1] - 0.5 * pad_m
    union = total - intersection
    iou_score = (intersection + smooth) / (union + smooth)
    mask_error = 1.0 - iou_score

    # ---- mse_loss(recon, x) ----
    n_elem = recon.size
    br_r = _choose_block_rows(n_elem)
    r_tiles, _, _ = _flatten_tiles(recon, br_r)
    x_tiles, _, _ = _flatten_tiles(x, br_r)
    sq_sum = _reduce_call(_sq_diff_sum_kernel, [r_tiles, x_tiles], 1, br_r, 1)[0]
    recon_error = sq_sum / float(n_elem)

    loss = mask_error + alpha * recon_error

    # ---- optional SparsityLoss(vector, density) ----
    if use_sparsity_loss:
        # vector: (N, 2, 3, W, H), density: (N, 2, W, H)
        N, _, _, W, H = vector.shape
        # sum_c (v_c * d)^2 == d^2 * sum_c v_c^2 ; fold the tiny channel-3
        # reduction into one fused XLA op so the kernel only streams two
        # density-sized arrays (no 3x-broadcast density materialized in HBM).
        vsq = jnp.sum(jnp.square(vector.astype(jnp.float32)), axis=2)  # (N,2,W,H)
        br_s = _choose_block_rows(vsq.size)
        w_tiles, _, _ = _flatten_tiles(vsq, br_s)
        d_tiles, _, _ = _flatten_tiles(density, br_s)
        sp_sum = _reduce_call(
            _weighted_sq_sum_kernel, [w_tiles, d_tiles], 1, br_s, 1)[0]
        # penalty.mean(): penalty has shape (N, W, H)
        loss = loss + sp_sum / float(N * W * H)

    return loss


# ----------------------------------------------------------------------------
# Pure-JAX reference (mirrors the PyTorch forward exactly)
# ----------------------------------------------------------------------------
def _ref_loss(recon, x, mask, y, vector=None, density=None,
              alpha=1.0, use_sparsity_loss=False, smooth=1e-4):
    conf = jax.nn.sigmoid(mask)
    intersection = jnp.sum(conf * y)
    total = jnp.sum(conf + y)
    union = total - intersection
    iou_score = (intersection + smooth) / (union + smooth)
    loss = (1.0 - iou_score) + alpha * jnp.mean((recon - x) ** 2)
    if use_sparsity_loss:
        s1v, s2v = vector[:, 0], vector[:, 1]
        s1d, s2d = density[:, 0:1, :, :], density[:, 1:2, :, :]
        penalty = (jnp.sum((s1v * s1d) ** 2, axis=1)
                   + jnp.sum((s2v * s2d) ** 2, axis=1))
        loss = loss + penalty.mean()
    return loss


if __name__ == "__main__":
    key = jax.random.PRNGKey(0)
    k1, k2, k3, k4, k5, k6 = jax.random.split(key, 6)

    N, C, H, W = 2, 3, 16, 16
    recon = jax.random.normal(k1, (N, C, H, W), jnp.float32)
    x = jax.random.normal(k2, (N, C, H, W), jnp.float32)
    mask = jax.random.normal(k3, (N, 1, H, W), jnp.float32)                   # logits
    y = (jax.random.uniform(k4, (N, 1, H, W)) > 0.5).astype(jnp.float32)      # targets
    vector = jax.random.normal(k5, (N, 2, 3, W, H), jnp.float32)
    density = jax.random.uniform(k6, (N, 2, W, H), jnp.float32)

    # default path (use_sparisty_loss=False)
    out = recon_iou_loss(recon, x, mask, y, alpha=1.0, use_sparsity_loss=False)
    out = jax.block_until_ready(out)
    ref = _ref_loss(recon, x, mask, y, alpha=1.0, use_sparsity_loss=False)
    assert jnp.allclose(out, ref, rtol=1e-4, atol=1e-4), (out, ref)

    # sparsity path
    out_sp = recon_iou_loss(recon, x, mask, y, vector=vector, density=density,
                            alpha=1.0, use_sparsity_loss=True)
    out_sp = jax.block_until_ready(out_sp)
    ref_sp = _ref_loss(recon, x, mask, y, vector=vector, density=density,
                       alpha=1.0, use_sparsity_loss=True)
    assert jnp.allclose(out_sp, ref_sp, rtol=1e-4, atol=1e-4), (out_sp, ref_sp)

    print("KERNEL_OK")
</pallas_src>

<mosaic_0001>
module attributes {stable_mosaic.version = 11 : i64} {
  func.func @_iou_sums_kernel(%arg0: i32, %arg1: memref<8x128xf32, #tpu.memory_space<vmem>>, %arg2: memref<8x128xf32, #tpu.memory_space<vmem>>, %arg3: memref<2xf32, #tpu.memory_space<smem>>, %arg4: memref<8x128xf32, #tpu.memory_space<vmem>>, %arg5: memref<8x128xf32, #tpu.memory_space<vmem>>) attributes {dimension_semantics = [#tpu.dimension_semantics<arbitrary>], iteration_bounds = array<i64: 1>, scalar_prefetch = 0 : i64, scratch_operands = 2 : i64, tpu.core_type = #tpu.core_type<tc>, window_params = [{transform_indices = @transform_0, window_bounds = array<i64: 8, 128>}, {transform_indices = @transform_1, window_bounds = array<i64: 8, 128>}, {transform_indices = @transform_2, window_bounds = array<i64: 2>}]} {
    %c0_i32 = arith.constant 0 : i32
    %0 = arith.cmpi eq, %arg0, %c0_i32 : i32
    %1 = arith.extui %0 : i1 to i32
    %c0_i32_0 = arith.constant 0 : i32
    %2 = arith.cmpi ne, %1, %c0_i32_0 : i32
    scf.if %2 {
      %cst_16 = arith.constant 0.000000e+00 : f32
      %25 = vector.broadcast %cst_16 : f32 to vector<8x128xf32>
      %c0_17 = arith.constant 0 : index
      %c0_18 = arith.constant 0 : index
      %26 = vector.load %arg4[%c0_17, %c0_18] : memref<8x128xf32, #tpu.memory_space<vmem>>, vector<8x128xf32>
      tpu.vector_store %arg4[%c0_17, %c0_18], %25 {strides = array<i32>} : memref<8x128xf32, #tpu.memory_space<vmem>>, vector<8x128xf32>,
      %cst_19 = arith.constant 0.000000e+00 : f32
      %27 = vector.broadcast %cst_19 : f32 to vector<8x128xf32>
      %c0_20 = arith.constant 0 : index
      %c0_21 = arith.constant 0 : index
      %28 = vector.load %arg5[%c0_20, %c0_21] : memref<8x128xf32, #tpu.memory_space<vmem>>, vector<8x128xf32>
      tpu.vector_store %arg5[%c0_20, %c0_21], %27 {strides = array<i32>} : memref<8x128xf32, #tpu.memory_space<vmem>>, vector<8x128xf32>,
    } else {
    }
    %c0 = arith.constant 0 : index
    %c0_1 = arith.constant 0 : index
    %3 = vector.load %arg1[%c0, %c0_1] : memref<8x128xf32, #tpu.memory_space<vmem>>, vector<8x128xf32>
    %4 = arith.negf %3 : vector<8x128xf32>
    %5 = math.exp %4 : vector<8x128xf32>
    %cst = arith.constant 1.000000e+00 : f32
    %6 = vector.broadcast %cst : f32 to vector<8x128xf32>
    %7 = arith.addf %6, %5 : vector<8x128xf32>
    %8 = arith.divf %6, %7 : vector<8x128xf32>
    %c0_2 = arith.constant 0 : index
    %c0_3 = arith.constant 0 : index
    %9 = vector.load %arg2[%c0_2, %c0_3] : memref<8x128xf32, #tpu.memory_space<vmem>>, vector<8x128xf32>
    %c0_4 = arith.constant 0 : index
    %c0_5 = arith.constant 0 : index
    %10 = vector.load %arg4[%c0_4, %c0_5] : memref<8x128xf32, #tpu.memory_space<vmem>>, vector<8x128xf32>
    %11 = arith.mulf %8, %9 : vector<8x128xf32>
    %12 = vector.shape_cast %11 : vector<8x128xf32> to vector<1x8x128xf32>
    %cst_6 = arith.constant dense<0.000000e+00> : vector<8x128xf32>
    %13 = vector.multi_reduction <add>, %12, %cst_6 [0] : vector<1x8x128xf32> to vector<8x128xf32>
    %14 = arith.addf %10, %13 : vector<8x128xf32>
    %c0_7 = arith.constant 0 : index
    %c0_8 = arith.constant 0 : index
    %15 = vector.load %arg4[%c0_7, %c0_8] : memref<8x128xf32, #tpu.memory_space<vmem>>, vector<8x128xf32>
    tpu.vector_store %arg4[%c0_7, %c0_8], %14 {strides = array<i32>} : memref<8x128xf32, #tpu.memory_space<vmem>>, vector<8x128xf32>,
    %c0_9 = arith.constant 0 : index
    %c0_10 = arith.constant 0 : index
    %16 = vector.load %arg5[%c0_9, %c0_10] : memref<8x128xf32, #tpu.memory_space<vmem>>, vector<8x128xf32>
    %17 = arith.addf %8, %9 : vector<8x128xf32>
    %18 = vector.shape_cast %17 : vector<8x128xf32> to vector<1x8x128xf32>
    %cst_11 = arith.constant dense<0.000000e+00> : vector<8x128xf32>
    %19 = vector.multi_reduction <add>, %18, %cst_11 [0] : vector<1x8x128xf32> to vector<8x128xf32>
    %20 = arith.addf %16, %19 : vector<8x128xf32>
    %c0_12 = arith.constant 0 : index
    %c0_13 = arith.constant 0 : index
    %21 = vector.load %arg5[%c0_12, %c0_13] : memref<8x128xf32, #tpu.memory_space<vmem>>, vector<8x128xf32>
    tpu.vector_store %arg5[%c0_12, %c0_13], %20 {strides = array<i32>} : memref<8x128xf32, #tpu.memory_space<vmem>>, vector<8x128xf32>,
    %c0_i32_14 = arith.constant 0 : i32
    %22 = arith.cmpi eq, %arg0, %c0_i32_14 : i32
    %23 = arith.extui %22 : i1 to i32
    %c0_i32_15 = arith.constant 0 : i32
    %24 = arith.cmpi ne, %23, %c0_i32_15 : i32
    scf.if %24 {
      %c0_16 = arith.constant 0 : index
      %c0_17 = arith.constant 0 : index
      %25 = vector.load %arg4[%c0_16, %c0_17] : memref<8x128xf32, #tpu.memory_space<vmem>>, vector<8x128xf32>
      %26 = vector.shape_cast %25 : vector<8x128xf32> to vector<1x8x128xf32>
      %cst_18 = arith.constant dense<0.000000e+00> : vector<1xf32>
      %27 = vector.multi_reduction <add>, %26, %cst_18 [1, 2] : vector<1x8x128xf32> to vector<1xf32>
      %28 = vector.shape_cast %27 : vector<1xf32> to vector<1x1x1xf32>
      %29 = vector.extract %28[0, 0, 0] : f32 from vector<1x1x1xf32>
      %c0_19 = arith.constant 0 : index
      %30 = memref.load %arg3[%c0_19] : memref<2xf32, #tpu.memory_space<smem>>
      memref.store %29, %arg3[%c0_19] : memref<2xf32, #tpu.memory_space<smem>>
      %c0_20 = arith.constant 0 : index
      %c0_21 = arith.constant 0 : index
      %31 = vector.load %arg5[%c0_20, %c0_21] : memref<8x128xf32, #tpu.memory_space<vmem>>, vector<8x128xf32>
      %32 = vector.shape_cast %31 : vector<8x128xf32> to vector<1x8x128xf32>
      %cst_22 = arith.constant dense<0.000000e+00> : vector<1xf32>
      %33 = vector.multi_reduction <add>, %32, %cst_22 [1, 2] : vector<1x8x128xf32> to vector<1xf32>
      %34 = vector.shape_cast %33 : vector<1xf32> to vector<1x1x1xf32>
      %35 = vector.extract %34[0, 0, 0] : f32 from vector<1x1x1xf32>
      %c1 = arith.constant 1 : index
      %36 = memref.load %arg3[%c1] : memref<2xf32, #tpu.memory_space<smem>>
      memref.store %35, %arg3[%c1] : memref<2xf32, #tpu.memory_space<smem>>
    } else {
    }
    return
  }
  func.func @transform_0(%arg0: i32) -> (i32, i32) {
    %c0_i32 = arith.constant 0 : i32
    %c0_i32_0 = arith.constant 0 : i32
    return %arg0, %c0_i32 : i32, i32
  }
  func.func @transform_1(%arg0: i32) -> (i32, i32) {
    %c0_i32 = arith.constant 0 : i32
    %c0_i32_0 = arith.constant 0 : i32
    return %arg0, %c0_i32 : i32, i32
  }
  func.func @transform_2(%arg0: i32) -> i32 {
    %c0_i32 = arith.constant 0 : i32
    %c0_i32_0 = arith.constant 0 : i32
    return %c0_i32 : i32
  }
}

module attributes {stable_mosaic.version = 11 : i64} {
  func.func @_sq_diff_sum_kernel(%arg0: i32, %arg1: memref<16x128xf32, #tpu.memory_space<vmem>>, %arg2: memref<16x128xf32, #tpu.memory_space<vmem>>, %arg3: memref<1xf32, #tpu.memory_space<smem>>, %arg4: memref<8x128xf32, #tpu.memory_space<vmem>>) attributes {dimension_semantics = [#tpu.dimension_semantics<arbitrary>], iteration_bounds = array<i64: 1>, scalar_prefetch = 0 : i64, scratch_operands = 1 : i64, tpu.core_type = #tpu.core_type<tc>, window_params = [{transform_indices = @transform_0, window_bounds = array<i64: 16, 128>}, {transform_indices = @transform_1, window_bounds = array<i64: 16, 128>}, {transform_indices = @transform_2, window_bounds = array<i64: 1>}]} {
    %c0_i32 = arith.constant 0 : i32
    %0 = arith.cmpi eq, %arg0, %c0_i32 : i32
    %1 = arith.extui %0 : i1 to i32
    %c0_i32_0 = arith.constant 0 : i32
    %2 = arith.cmpi ne, %1, %c0_i32_0 : i32
    scf.if %2 {
      %cst_10 = arith.constant 0.000000e+00 : f32
      %15 = vector.broadcast %cst_10 : f32 to vector<8x128xf32>
      %c0_11 = arith.constant 0 : index
      %c0_12 = arith.constant 0 : index
      %16 = vector.load %arg4[%c0_11, %c0_12] : memref<8x128xf32, #tpu.memory_space<vmem>>, vector<8x128xf32>
      tpu.vector_store %arg4[%c0_11, %c0_12], %15 {strides = array<i32>} : memref<8x128xf32, #tpu.memory_space<vmem>>, vector<8x128xf32>,
    } else {
    }
    %c0 = arith.constant 0 : index
    %c0_1 = arith.constant 0 : index
    %3 = vector.load %arg1[%c0, %c0_1] : memref<16x128xf32, #tpu.memory_space<vmem>>, vector<16x128xf32>
    %c0_2 = arith.constant 0 : index
    %c0_3 = arith.constant 0 : index
    %4 = vector.load %arg2[%c0_2, %c0_3] : memref<16x128xf32, #tpu.memory_space<vmem>>, vector<16x128xf32>
    %5 = arith.subf %3, %4 : vector<16x128xf32>
    %c0_4 = arith.constant 0 : index
    %c0_5 = arith.constant 0 : index
    %6 = vector.load %arg4[%c0_4, %c0_5] : memref<8x128xf32, #tpu.memory_space<vmem>>, vector<8x128xf32>
    %7 = arith.mulf %5, %5 : vector<16x128xf32>
    %8 = vector.shape_cast %7 : vector<16x128xf32> to vector<2x8x128xf32>
    %cst = arith.constant dense<0.000000e+00> : vector<8x128xf32>
    %9 = vector.multi_reduction <add>, %8, %cst [0] : vector<2x8x128xf32> to vector<8x128xf32>
    %10 = arith.addf %6, %9 : vector<8x128xf32>
    %c0_6 = arith.constant 0 : index
    %c0_7 = arith.constant 0 : index
    %11 = vector.load %arg4[%c0_6, %c0_7] : memref<8x128xf32, #tpu.memory_space<vmem>>, vector<8x128xf32>
    tpu.vector_store %arg4[%c0_6, %c0_7], %10 {strides = array<i32>} : memref<8x128xf32, #tpu.memory_space<vmem>>, vector<8x128xf32>,
    %c0_i32_8 = arith.constant 0 : i32
    %12 = arith.cmpi eq, %arg0, %c0_i32_8 : i32
    %13 = arith.extui %12 : i1 to i32
    %c0_i32_9 = arith.constant 0 : i32
    %14 = arith.cmpi ne, %13, %c0_i32_9 : i32
    scf.if %14 {
      %c0_10 = arith.constant 0 : index
      %c0_11 = arith.constant 0 : index
      %15 = vector.load %arg4[%c0_10, %c0_11] : memref<8x128xf32, #tpu.memory_space<vmem>>, vector<8x128xf32>
      %16 = vector.shape_cast %15 : vector<8x128xf32> to vector<1x8x128xf32>
      %cst_12 = arith.constant dense<0.000000e+00> : vector<1xf32>
      %17 = vector.multi_reduction <add>, %16, %cst_12 [1, 2] : vector<1x8x128xf32> to vector<1xf32>
      %18 = vector.shape_cast %17 : vector<1xf32> to vector<1x1x1xf32>
      %19 = vector.extract %18[0, 0, 0] : f32 from vector<1x1x1xf32>
      %c0_13 = arith.constant 0 : index
      %20 = memref.load %arg3[%c0_13] : memref<1xf32, #tpu.memory_space<smem>>
      memref.store %19, %arg3[%c0_13] : memref<1xf32, #tpu.memory_space<smem>>
    } else {
    }
    return
  }
  func.func @transform_0(%arg0: i32) -> (i32, i32) {
    %c0_i32 = arith.constant 0 : i32
    %c0_i32_0 = arith.constant 0 : i32
    return %arg0, %c0_i32 : i32, i32
  }
  func.func @transform_1(%arg0: i32) -> (i32, i32) {
    %c0_i32 = arith.constant 0 : i32
    %c0_i32_0 = arith.constant 0 : i32
    return %arg0, %c0_i32 : i32, i32
  }
  func.func @transform_2(%arg0: i32) -> i32 {
    %c0_i32 = arith.constant 0 : i32
    %c0_i32_0 = arith.constant 0 : i32
    return %c0_i32 : i32
  }
}

</mosaic_0001>

<bundles_post_ra>
// kernel: recon_iou_loss.3
= control target key start
LH: loop header
LB: loop body
LE: loop exit
PB: predicated region body
PF: predicated region fallthrough
CT: control target
= control target key end

     0   :  { %s107_s0 = inlined_call_operand.vmem [shape: f32[16,128], index: 0, kind: input, shape index: {}]   ;;  %s108_s1 = inlined_call_operand.vmem [shape: f32[16,128], index: 1, kind: input, shape index: {}]   ;;  %s109_s2 = inlined_call_operand.hbm [shape: f32[1], index: 2, kind: output, shape index: {}]  }
   0x1   :  { %v17_v0 = vld [vmem:[%s107_s0] sm:$0xff]  ;;  %v18_v1 = vld [vmem:[%s107_s0 + $0x8] sm:$0xff] }
   0x2   :  { %v19_v2 = vld [vmem:[%s108_s1] sm:$0xff]  ;;  %v20_v3 = vld [vmem:[%s108_s1 + $0x8] sm:$0xff] }
   0x3   :  { %v21_v4 = vsub.f32 %v17_v0, %v19_v2 }
   0x4   :  { %7 = vsyncpa [#allocation4], 0  ;;  %v22_v5 = vsub.f32 %v18_v1, %v20_v3  ;;  %s49_s18 = sshll.u32 %s109_s2, 4  ;;  %s76_s19 = smov [#allocation3]   ;;  %s50_s18 = int_to_ptr.hbm [resolvable:$true] %s49_s18 }
   0x5   :  { %v24_v6 = vmul.f32 %v21_v4, %v21_v4 }
   0x6   :  { %v25_v7 = vmul.f32 %v22_v5, %v22_v5 }
   0x8   :  { %v26_v8 = vadd.f32 %v25_v7, %v24_v6 }
   0xa   :  { %33 = vadd.xlane.f32.xlu0 %v26_v8 }
  0x7d   :  { %v34_v9 = vpop.xlane.xlu0 %33 }
  0x7e   :  { %v35_v10 = vrot.slane %v34_v9, 4 }
  0x80   :  { %v36_v11 = vadd.f32 %v35_v10, %v34_v9 }
  0x82   :  { %v37_v12 = vrot.slane %v36_v11, 2 }
  0x84   :  { %v38_v13 = vadd.f32 %v37_v12, %v36_v11 }
  0x86   :  { %v39_v14 = vrot.slane %v38_v13, 1 }
  0x88   :  { %v40_v15 = vadd.f32 %v39_v14, %v38_v13 }
  0x8a   :  { %59 = vpush %v40_v15 }
  0xbb   :  { %s60_s1 = spop %59 }
  0xbc   :  { %43 = sst [smem:[#allocation3]] %s60_s1 }
  0xbd   :  { %52 = dma.smem_to_hbm %s76_s19, 16, %s50_s18, [#allocation4]  }
  0xbe   :  { %74 = dma.done.wait [#allocation4], 16  }
  0xbf   :  { %75 = vsyncadd [#allocation4], 4294967280 }
  0xc0   :  { %57 = sfence }
  0xc1   :  { %58 = vsyncpa [#allocation4], 1 }

// kernel: recon_iou_loss.2
= control target key start
LH: loop header
LB: loop body
LE: loop exit
PB: predicated region body
PF: predicated region fallthrough
CT: control target
= control target key end

     0   :  { %s140_s0 = inlined_call_operand.vmem [shape: f32[8,128], index: 0, kind: input, shape index: {}]   ;;  %s141_s1 = inlined_call_operand.vmem [shape: f32[8,128], index: 1, kind: input, shape index: {}]   ;;  %s142_s2 = inlined_call_operand.vmem [shape: f32[2], index: 2, kind: output, shape index: {}]  }
   0x1   :  { %v18_v0 = vld [vmem:[%s140_s0] sm:$0xff] }
   0x2   :  { %7 = vsyncpa [#allocation5], 0  ;;  %v91_v1 = vmul.f32 -1.442695, %v18_v0  ;;  %v38_v12 = vld [vmem:[%s141_s1] sm:$0xff]  ;;  %s81_s14 = sshll.u32 %s142_s2, 4  ;;  %s82_s14 = int_to_ptr.vmem [resolvable:$true] %s81_s14 }
   0x3   :  { %s115_s16 = smov [#allocation4]  }
   0x4   :  { %97 = vpow2.f32 %v91_v1 }
   0xa   :  { %v98_v2 = vpop.eup %97 }
   0xb   :  { %v22_v3 = vadd.f32 1.0, %v98_v2 }
   0xd   :  { %99 = vrcp.f32 %v22_v3  ;;  %v34_v6 = vand.u32 2147483648, %v22_v3  ;;  %vm28_vm0 = vweird.f32 %v22_v3  ;;  %v32_v8 = vand.u32 2147483647, %v22_v3 }
   0xf   :  { %v35_v10 = vor.u32 1.1754944e-38, %v34_v6  ;;  %vm33_vm3 = vcmp.eq.f32.partialorder %v32_v8, 8.507059e+37 }
  0x13   :  { %v100_v4 = vpop.eup %99 }
  0x14   :  { %v24_v5 = vmul.f32 %v100_v4, %v22_v3  ;;  %vm29_vm1 = vweird.f32 %v100_v4 }
  0x15   :  { %vm30_vm2 = vmor %vm28_vm0, %vm29_vm1 }
  0x16   :  { %v25_v7 = vsub.f32 1.0, %v24_v5 }
  0x18   :  { %v26_v9 = vmul.f32 %v100_v4, %v25_v7 }
  0x1a   :  { %v27_v11 = vadd.f32 %v100_v4, %v26_v9 }
  0x1c   :  { %v31_v13 = vsel %vm30_vm2, %v100_v4, %v27_v11 }
  0x1d   :  { %v36_v14 = vsel %vm33_vm3, %v35_v10, %v31_v13 }
  0x1e   :  { %v40_v15 = vmul.f32 %v38_v12, %v36_v14  ;;  %v45_v16 = vadd.f32 %v38_v12, %v36_v14 }
  0x20   :  { %53 = vadd.xlane.f32.xlu0 %v40_v15 }
  0x28   :  { %65 = vadd.xlane.f32.xlu0 %v45_v16 }
  0x93   :  { %v54_v17 = vpop.xlane.xlu0 %53 }
  0x94   :  { %v55_v18 = vrot.slane %v54_v17, 4 }
  0x96   :  { %v56_v19 = vadd.f32 %v55_v18, %v54_v17 }
  0x98   :  { %v57_v20 = vrot.slane %v56_v19, 2 }
  0x9a   :  { %v58_v21 = vadd.f32 %v57_v20, %v56_v19 }
  0x9b   :  { %v66_v22 = vpop.xlane.xlu0 %65 }
  0x9c   :  { %v67_v23 = vrot.slane %v66_v22, 4  ;;  %v59_v24 = vrot.slane %v58_v21, 1 }
  0x9e   :  { %v68_v25 = vadd.f32 %v67_v23, %v66_v22  ;;  %v60_v26 = vadd.f32 %v59_v24, %v58_v21 }
  0xa0   :  { %v69_v27 = vrot.slane %v68_v25, 2  ;;  %92 = vpush %v60_v26 }
  0xa2   :  { %v70_v28 = vadd.f32 %v69_v27, %v68_v25 }
  0xa4   :  { %v71_v29 = vrot.slane %v70_v28, 1 }
  0xa6   :  { %v72_v30 = vadd.f32 %v71_v29, %v70_v28 }
  0xa8   :  { %94 = vpush %v72_v30 }
  0xd1   :  { %s93_s1 = spop %92 }
  0xd2   :  { %63 = sst [smem:[#allocation4]] %s93_s1 }
  0xd9   :  { %s95_s15 = spop %94 }
  0xda   :  { %75 = sst [smem:[#allocation4 + $0x1]] %s95_s15 }
  0xdb   :  { %84 = dma.smem_to_vmem %s115_s16, 16, %s82_s14, [#allocation5]  }
  0xdc   :  { %113 = dma.done.wait [#allocation5], 16  }
  0xdd   :  { %114 = vsyncadd [#allocation5], 4294967280 }
  0xde   :  { %89 = sfence }
  0xdf   :  { %90 = vsyncpa [#allocation5], 1 }

</bundles_post_ra>
